<compile_context>
chip_gen: v5e
topology: v5e:2x2
jax: 0.10.0
libtpu: 0.0.40
codegen_flags: <defaults>
</compile_context>

<pallas_src>
import math

import jax
import jax.numpy as jnp
from jax.experimental import pallas as pl
from jax.experimental.pallas import tpu as pltpu


def _cdiv(a, b):
    return -(-a // b)


def _norm_kernel(x_ref, mean_ref, inv_std_ref, o_ref):
    # x_ref / o_ref          : (R, T) lane-dense tile of the (N*C, H*W) view
    # mean_ref / inv_std_ref : (R, 128) per-row constants (all lanes identical)
    x = x_ref[...].astype(jnp.float32)
    mean = mean_ref[...][:, :1]      # (R, 1): lane broadcast below is free (HBM-bound)
    inv = inv_std_ref[...][:, :1]
    o_ref[...] = ((x - mean) * inv).astype(o_ref.dtype)


def _pallas_channel_norm(x_nchw, mean, std, *,
                         total_vmem_budget=40 << 20,   # total double-buffered footprint cap
                         per_tile_cap=8 << 20):        # cap on a single x tile
    """Per-channel normalization (x - mean[c]) / std[c] of an NCHW tensor."""
    N, C, H, W = x_nchw.shape
    HW = H * W
    R_total = N * C

    in_it = jnp.dtype(x_nchw.dtype).itemsize
    # Integer images produce float output (Normalize-like semantics); float stays same dtype.
    out_dtype = x_nchw.dtype if jnp.issubdtype(x_nchw.dtype, jnp.floating) else jnp.float32
    out_it = jnp.dtype(out_dtype).itemsize

    # Sublane base: packed-dtype sublane multiple AND a multiple of C so the
    # per-row channel pattern is identical in every row block.
    sub = 8 if in_it >= 4 else 32 // in_it            # 8 f32 / 16 bf16 / 32 int8
    r_base = (sub * C) // math.gcd(sub, C)            # lcm(sub, C)
    # TODO(synk): very large channel counts make r_base (= lcm(8, C)) rows exceed the
    # per-tile cap; would need an in-kernel channel gather instead of pre-tiled rows.

    const_row_bytes = 2 * 128 * 4                     # mean + inv_std, f32, 128 lanes, per row

    # ---- column tile: largest 128-multiple within budget; partial edge block is OK.
    if HW >= 128:
        cols_total = (total_vmem_budget // (2 * r_base) - const_row_bytes) // (in_it + out_it)
        cols_cap = per_tile_cap // (r_base * in_it)
        cols_budget = max(128, (min(cols_total, cols_cap) // 128) * 128)
        t_cols = min((HW // 128) * 128, cols_budget)
    else:
        t_cols = HW                                    # full extent: always legal

    # ---- row tile: budget against the full double-buffered footprint 2*(x+out+consts).
    row_cost = 2 * (t_cols * (in_it + out_it) + const_row_bytes)
    rows_total = total_vmem_budget // row_cost
    rows_cap = per_tile_cap // max(1, t_cols * in_it)
    r_max = max(r_base, (min(rows_total, rows_cap) // r_base) * r_base)
    r_block = R_total if r_max >= R_total else r_max   # full extent or multiple of r_base

    # ---- keep >= ~4 grid steps so pipelining / 2-TC megacore have work.
    grid_rows = _cdiv(R_total, r_block)
    grid_cols = _cdiv(HW, t_cols)
    while grid_rows * grid_cols < 4:
        if t_cols > 128:
            t_cols = max(128, ((t_cols // 2) // 128) * 128)
            grid_cols = _cdiv(HW, t_cols)
        elif r_block > r_base:
            r_block = max(r_base, ((r_block // 2) // r_base) * r_base)
            grid_rows = _cdiv(R_total, r_block)
        else:
            break

    # ---- narrow lane-dense per-row constants (tiny: r_block x 128 f32).
    ch = jnp.arange(r_block, dtype=jnp.int32) % C
    mean_tile = jnp.broadcast_to(mean.astype(jnp.float32)[ch][:, None], (r_block, 128))
    inv_tile = jnp.broadcast_to((1.0 / std.astype(jnp.float32))[ch][:, None], (r_block, 128))

    footprint = 2 * r_block * (t_cols * (in_it + out_it) + const_row_bytes)
    vmem_limit = int(max(32 << 20, footprint + (12 << 20)))   # <= ~52 MiB by construction

    xf = x_nchw.reshape(R_total, HW)
    out = pl.pallas_call(
        _norm_kernel,
        out_shape=jax.ShapeDtypeStruct((R_total, HW), out_dtype),
        grid_spec=pltpu.PrefetchScalarGridSpec(
            num_scalar_prefetch=0,
            grid=(grid_rows, grid_cols),
            in_specs=[
                pl.BlockSpec((r_block, t_cols), lambda i, j: (i, j)),
                pl.BlockSpec((r_block, 128), lambda i, j: (0, 0)),
                pl.BlockSpec((r_block, 128), lambda i, j: (0, 0)),
            ],
            out_specs=pl.BlockSpec((r_block, t_cols), lambda i, j: (i, j)),
        ),
        compiler_params=pltpu.CompilerParams(
            dimension_semantics=("parallel", "parallel"),
            vmem_limit_bytes=vmem_limit,
        ),
    )(xf, mean_tile, inv_tile)
    return out.reshape(N, C, H, W)


class Transform:
    """JAX/Pallas equivalent of the PyTorch `Transform` module."""

    def __init__(self, transform=None):
        self.transform = transform

    def __call__(self, x):
        if self.transform is None:
            return x
        assert x.ndim >= 4, (
            "The dimension of input should be greater than or equal to 4"
        )
        batch = x.shape[:-3]
        xf = x.reshape(-1, *x.shape[-3:])   # (-1, C, H, W)
        yf = self.transform(xf)             # Pallas hot path
        return yf.reshape(*batch, *yf.shape[1:])


if __name__ == "__main__":
    key = jax.random.PRNGKey(0)

    # Small shapes: leading batch dims (2, 3), channels=4, spatial 16x16.
    B0, B1, C, H, W = 2, 3, 4, 16, 16
    x = jax.random.normal(key, (B0, B1, C, H, W), dtype=jnp.float32)

    # Deterministic per-channel normalization parameters.
    mean = jnp.arange(C, dtype=jnp.float32) * 0.1
    std = 1.0 + jnp.arange(C, dtype=jnp.float32) * 0.05

    # Transform with the Pallas-backed per-channel normalization.
    module = Transform(transform=lambda img: _pallas_channel_norm(img, mean, std))
    y = jax.block_until_ready(module(x))

    # Identity case (transform=None) — module just returns the input.
    ident = Transform(transform=None)
    y_id = jax.block_until_ready(ident(x))

    # Reference check in plain JAX.
    ref = (x - mean.reshape(1, 1, C, 1, 1)) / std.reshape(1, 1, C, 1, 1)
    assert y.shape == (B0, B1, C, H, W)
    assert jnp.allclose(y, ref, atol=1e-5, rtol=1e-5)
    assert jnp.array_equal(y_id, x)

    print("KERNEL_OK")
</pallas_src>

<mosaic_0001>
module attributes {stable_mosaic.version = 11 : i64} {
  func.func @_norm_kernel(%arg0: i32, %arg1: i32, %arg2: memref<8x128xf32, #tpu.memory_space<vmem>>, %arg3: memref<8x128xf32, #tpu.memory_space<vmem>>, %arg4: memref<8x128xf32, #tpu.memory_space<vmem>>, %arg5: memref<8x128xf32, #tpu.memory_space<vmem>>) attributes {dimension_semantics = [#tpu.dimension_semantics<parallel>, #tpu.dimension_semantics<parallel>], iteration_bounds = array<i64: 3, 2>, scalar_prefetch = 0 : i64, scratch_operands = 0 : i64, tpu.core_type = #tpu.core_type<tc>, window_params = [{transform_indices = @transform_0, window_bounds = array<i64: 8, 128>}, {pipeline_mode = #tpu.pipeline_mode<synchronous>, transform_indices = @transform_1, window_bounds = array<i64: 8, 128>}, {pipeline_mode = #tpu.pipeline_mode<synchronous>, transform_indices = @transform_2, window_bounds = array<i64: 8, 128>}, {transform_indices = @transform_3, window_bounds = array<i64: 8, 128>}]} {
    %c0 = arith.constant 0 : index
    %c0_0 = arith.constant 0 : index
    %0 = vector.load %arg2[%c0, %c0_0] : memref<8x128xf32, #tpu.memory_space<vmem>>, vector<8x128xf32>
    %c0_1 = arith.constant 0 : index
    %c0_2 = arith.constant 0 : index
    %1 = vector.load %arg3[%c0_1, %c0_2] : memref<8x128xf32, #tpu.memory_space<vmem>>, vector<8x128xf32>
    %2 = vector.extract_strided_slice %1 {offsets = [0, 0], sizes = [8, 1], strides = [1, 1]} : vector<8x128xf32> to vector<8x1xf32>
    %c0_3 = arith.constant 0 : index
    %c0_4 = arith.constant 0 : index
    %3 = vector.load %arg4[%c0_3, %c0_4] : memref<8x128xf32, #tpu.memory_space<vmem>>, vector<8x128xf32>
    %4 = vector.extract_strided_slice %3 {offsets = [0, 0], sizes = [8, 1], strides = [1, 1]} : vector<8x128xf32> to vector<8x1xf32>
    %5 = vector.broadcast %2 : vector<8x1xf32> to vector<8x128xf32>
    %6 = arith.subf %0, %5 : vector<8x128xf32>
    %7 = vector.broadcast %4 : vector<8x1xf32> to vector<8x128xf32>
    %8 = arith.mulf %6, %7 : vector<8x128xf32>
    %c0_5 = arith.constant 0 : index
    %c0_6 = arith.constant 0 : index
    %9 = vector.load %arg5[%c0_5, %c0_6] : memref<8x128xf32, #tpu.memory_space<vmem>>, vector<8x128xf32>
    tpu.vector_store %arg5[%c0_5, %c0_6], %8 {strides = array<i32>} : memref<8x128xf32, #tpu.memory_space<vmem>>, vector<8x128xf32>,
    return
  }
  func.func @transform_0(%arg0: i32, %arg1: i32) -> (i32, i32) {
    %c0_i32 = arith.constant 0 : i32
    return %arg0, %arg1 : i32, i32
  }
  func.func @transform_1(%arg0: i32, %arg1: i32) -> (i32, i32) {
    %c0_i32 = arith.constant 0 : i32
    %c0_i32_0 = arith.constant 0 : i32
    %c0_i32_1 = arith.constant 0 : i32
    return %c0_i32, %c0_i32_0 : i32, i32
  }
  func.func @transform_2(%arg0: i32, %arg1: i32) -> (i32, i32) {
    %c0_i32 = arith.constant 0 : i32
    %c0_i32_0 = arith.constant 0 : i32
    %c0_i32_1 = arith.constant 0 : i32
    return %c0_i32, %c0_i32_0 : i32, i32
  }
  func.func @transform_3(%arg0: i32, %arg1: i32) -> (i32, i32) {
    %c0_i32 = arith.constant 0 : i32
    return %arg0, %arg1 : i32, i32
  }
}

</mosaic_0001>

<bundles_post_ra>
// kernel: tpu_custom_call.1
= control target key start
LH: loop header
LB: loop body
LE: loop exit
PB: predicated region body
PF: predicated region fallthrough
CT: control target
= control target key end

     0   :  { %s886_s0 = inlined_call_operand.hbm [shape: f32[24,256], index: 0, kind: input, shape index: {}]   ;;  %s887_s1 = inlined_call_operand.hbm [shape: f32[8,128], index: 1, kind: input, shape index: {}]   ;;  %s888_s2 = inlined_call_operand.hbm [shape: f32[8,128], index: 2, kind: input, shape index: {}]   ;;  %s889_s3 = inlined_call_operand.hbm [shape: f32[24,256], index: 3, kind: output, shape index: {}]  }
   0x1   :  { %894 = sst [smem:[#allocation16_spill]] %s887_s1 }
   0x2   :  { %895 = sst [smem:[#allocation17_spill]] %s888_s2 }
   0x3   :  { %8 = vsyncpa [#allocation3], 0 }
   0x4   :  { %10 = vsyncpa [#allocation3 + $0x1], 0 }
   0x5   :  { %11 = vsyncpa [#allocation6], 0 }
   0x6   :  { %12 = vsyncpa [#allocation4], 0 }
   0x7   :  { %14 = vsyncpa [#allocation4 + $0x1], 0  ;;  %s710_s12 = smov 0   ;;  %s712_s13 = smov 0  }
   0x8   :  { %s714_s14 = smov 0   ;;  %s716_s15 = smov 0  }
   0x9   :  { %s718_s16 = smov 0   ;;  %s720_s17 = smov 0  }
   0xa   :  { %s722_s18 = smov 0   ;;  %s724_s19 = smov 0  }
   0xb LB: > { %896 = sst [smem:[#allocation12_spill]] %s657_s12  ;;  %s373_s20 = sadd.s32 4294967295, %s685_s19   ;;  %s685_s19 = sphi %s724_s19, %s20_s19   ;;  %s681_s18 = sphi %s722_s18, %s919_s18   ;;  %s677_s17 = sphi %s720_s17, %s918_s17   ;;  %s673_s16 = sphi %s718_s16, %s917_s16   ;;  %s669_s15 = sphi %s716_s15, %s916_s15   ;;  %s665_s14 = sphi %s714_s14, %s915_s14   ;;  %s661_s13 = sphi %s712_s13, %s914_s13   ;;  %s657_s12 = sphi %s710_s12, %s913_s12  }
   0xc   : > { %s374_s21 = sadd.s32 4294967294, %s685_s19   ;;  %p54_p0 = scmp.ne.s32.totalorder %s661_s13, %s657_s12 }
   0xd   : > { %p754_p1 = scmp.eq.s32.totalorder %s373_s20, 0  ;;  %p758_p2 = scmp.eq.s32.totalorder %s373_s20, 5 }
   0xe   : > { %p128_p3 = scmp.eq.s32.totalorder %s374_s21, 5  ;;  %p375_p5 = scmp.ge.s32.totalorder %s685_s19, 1 }
   0xf   : > { %p764_p4 = por %p754_p1, %p54_p0  ;;  %p135_p7 = scmp.lt.s32.totalorder %s685_s19, 7 }
  0x10   : > { %p769_p6 = por %p128_p3, %p54_p0  ;;  %s902_s1 = sld [smem:[#allocation16_spill]] }
  0x11   : > { %p777_p8 = pnand %p375_p5, %p135_p7  ;;  %s687_s30 = smov [#allocation5]  }
  0x12   : > { %s900_s25 = scalar_select %p769_p6, 1, 0 }
  0x13   : > { %p404_p9 = pneg %p777_p8  ;;  %s149_s4 = sshll.u32 %s687_s30, 4  ;;  %s150_s4 = int_to_ptr.vmem [resolvable:$true] %s149_s4 }
  0x14   : > { %901 = sst [smem:[#allocation13_spill]] %s900_s25  ;;  %s688_s8 = smov [#allocation7]  }
  0x15   : > { %s904_s2 = sld [smem:[#allocation17_spill]]  ;;  %p405_p10 = pnand %p404_p9, %p754_p1 }
  0x16   : > { %s147_s28 = sshll.u32 %s902_s1, 4  ;;  %s161_s9 = sshll.u32 %s688_s8, 4  ;;  %s148_s28 = int_to_ptr.hbm [resolvable:$true] %s147_s28  ;;  %s162_s9 = int_to_ptr.vmem [resolvable:$true] %s161_s9 }
  0x17   : > { %407 = dma.hbm_to_vmem [thread:$0]  (!%p405_p10), %s148_s28, 128, %s150_s4, [#allocation6]  }
  0x18   : > { %s29_s10 = sadd.s32 1, %s677_s17  ;;  %s32_s11 = sadd.s32 1, %s681_s18 }
  0x19   : > { %p30_p11 = scmp.ge.s32.totalorder %s29_s10, 2  ;;  %s41_s20 = sadd.s32 1, %s665_s14 }
  0x1a   : > { %p48_p12 = scmp.ne.s32.totalorder %s665_s14, %s661_s13  ;;  %p49_p13 = scmp.eq.s32.totalorder %s685_s19, 0 }
  0x1b   : > { %s159_s7 = sshll.u32 %s904_s2, 4  ;;  %s921_s10 = smov (%p30_p11, %s29_s10), 0  ;;  %s160_s7 = int_to_ptr.hbm [resolvable:$true] %s159_s7 }
  0x1c   : > { %410 = dma.hbm_to_vmem [thread:$0]  (!%p405_p10), %s160_s7, 128, %s162_s9, [#allocation6]  }
  0x1d   : > { %905 = sst [smem:[#allocation14_spill]] %s921_s10  ;;  %s923_s11 = smov (!%p30_p11, %s32_s11), %s681_s18 }
  0x1e   : > { %s37_s21 = ssub.s32 %s677_s17, %s921_s10  ;;  %p799_p0 = por %p49_p13, %p48_p12 }
  0x1f   : > { %p34_p3 = scmp.ge.s32.totalorder %s923_s11, 3  ;;  %p805_p5 = por %p758_p2, %p48_p12 }
  0x20   : > { %p421_p7 = scmp.lt.s32.totalorder %s685_s19, 6  ;;  %s172_s28 = sand.u32 1, %s665_s14  }
  0x21   : > { %s925_s11 = smov (%p34_p3, %s923_s11), 0  ;;  %s379_s30 = sshll.u32 %s172_s28, 3 }
  0x22   : > { %908 = sst [smem:[#allocation15_spill]] %s925_s11  ;;  %s36_s4 = ssub.s32 %s681_s18, %s925_s11 }
  0x23   : > { %s38_s5 = sor.u32 %s37_s21, %s36_s4  ;;  %s380_s6 = sshll.u32 %s681_s18, 1 }
  0x24   : > { %p39_p9 = scmp.eq.s32.totalorder %s38_s5, 0  ;;  %s180_s7 = sadd.s32 %s677_s17, %s380_s6 }
  0x25   : > { %s381_s8 = sshll.u32 %s180_s7, 3  ;;  %s176_s9 = scalar_lea.vmem [#allocation2], %s379_s30 }
  0x26   : > { %s186_s23 = sshll.u32 %s176_s9, 4  ;;  %s182_s25 = scalar_lea.hbm %s886_s0, %s381_s8  ;;  %s187_s23 = int_to_ptr.vmem [resolvable:$true] %s186_s23 }
  0x27   : > { %s818_s1 = scalar_select %p39_p9, %s665_s14, %s41_s20  }
  0x28   : > { %s184_s12 = sshll.u32 %s182_s25, 4  ;;  %p412_p2 = pnand %p421_p7, %p799_p0  ;;  %s185_s12 = int_to_ptr.hbm [resolvable:$true] %s184_s12 }
  0x29   : > { %s173_s11 = scalar_lea.sflag [#allocation3], %s172_s28  ;;  %195 = sbr.rel (%p777_p8) target bundleno = 179 (0xb3), region = 32 }
  0x2a   : > { %414 = dma.hbm_to_vmem [thread:$0]  (!%p412_p2), %s185_s12, 128, %s187_s23, %s173_s11  }
  0x2b   : > { %s830_s21 = sand.u32 (!%p777_p8), 1, %s661_s13  }
  0x2c   : > { %s383_s20 = sshll.u32 (!%p777_p8), %s830_s21, 3  ;;  %s198_s2 = scalar_lea.sflag (!%p777_p8), [#allocation3], %s830_s21 }
  0x2d   : > { %s201_s10 = scalar_lea.vmem (!%p777_p8), [#allocation2], %s383_s20 }
  0x2e   : > { %644 = dma.done.wait (%p764_p4), %s198_s2, 128  }
  0x2f   : > { %646 = vsyncadd (%p764_p4), %s198_s2, 4294967168 }
  0x30   : > { %648 = dma.done.wait (%p754_p1), [#allocation6], 256  }
  0x31   : > { %650 = vsyncadd (%p754_p1), [#allocation6], 4294967040  ;;  %v689_v0 = vmov 0   ;;  %v236_v1 = vld [vmem:[#allocation5] sm:$0xff]  ;;  %v237_v2 = vld [vmem:[#allocation7] sm:$0xff]  ;;  %s388_s12 = sshll.u32 %s673_s16, 1 }
  0x32   : > { %492 = vset.pattern.permute.xlu0 %v689_v0  ;;  %s262_s25 = sadd.s32 %s669_s15, %s388_s12  ;;  %v235_v4 = vld [vmem:[%s201_s10] sm:$0xff]  ;;  %s234_s22 = scalar_lea.vmem [#allocation8], %s383_s20 }
  0x33   : > { %240 = vperm.xlu0 %492, %v236_v1   ;;  %s389_s24 = sshll.u32 %s262_s25, 3  ;;  %s266_s28 = sshll.u32 %s234_s22, 4  ;;  %s267_s28 = int_to_ptr.vmem [resolvable:$true] %s266_s28 }
  0x34   : > { %s264_s26 = scalar_lea.hbm %s889_s3, %s389_s24  ;;  %s252_s4 = scalar_lea.sflag [#allocation4], %s830_s21 }
  0x35   : > { %s268_s30 = sshll.u32 %s264_s26, 4  ;;  %s603_s7 = scalar_lea.hbm %s889_s3, 48  ;;  %s269_s30 = int_to_ptr.hbm [resolvable:$true] %s268_s30 }
  0x36   : > { %s597_s16 = sshra.s32 %s269_s30, 4  ;;  %s598_s16 = int_to_ptr.hbm [resolvable:$true] %s597_s16 }
  0x37   : > { %s599_s15 = scalar_lea.hbm %s598_s16, 8  ;;  %p604_p10 = scmp.lt.s32.totalorder %s598_s16, %s889_s3 }
  0x38   : > { %p600_p1 = scmp.ne.s32.totalorder %s598_s16, %s599_s15  ;;  %p605_p11 = scmp.lt.s32.totalorder %s603_s7, %s599_s15 }
  0x3a   : > { %p601_p4 = pnand %p600_p1, %p805_p5  ;;  %p606_p12 = por %p605_p11, %p604_p10 }
  0x3b   : > { %246 = vperm.xlu0 %492, %v237_v2  }
  0x3c   : > { %p602_p8 = pneg %p601_p4 }
  0x3e   : > { %p607_p13 = pnand %p606_p12, %p602_p8 }
  0xa5   : > { %v241_v3 = vpop.permute.xlu0 %240 }
  0xa6   : > { %v243_v5 = vsub.f32 %v235_v4, %v241_v3 }
  0xad   : > { %v247_v6 = vpop.permute.xlu0 %246 }
  0xae   : > { %v249_v7 = vmul.f32 %v247_v6, %v243_v5 }
  0xb0   : > { %250 = vst [vmem:[%s234_s22] sm:$0xff] %v249_v7 }
  0xb1   : > { %610 = shalt.err (!%p607_p13)
}
  0xb2   : > { %402 = dma.vmem_to_hbm [thread:$0]  (%p805_p5), %s267_s28, 128, %s269_s30, %s252_s4  }
  0xb3 PF: > { %s909_s23 = sld [smem:[#allocation12_spill]]  ;;  %p424_p0 = scmp.ge.s32.totalorder %s685_s19, 2 }
  0xb5   : > { %p416_p3 = pnand %p424_p0, %p769_p6 }
  0xb7   : > { %p417_p7 = pneg %p416_p3 }
  0xb9   : > { %s280_s20 = sand.u32 1, %s909_s23  }
  0xba   : > { %s281_s2 = scalar_lea.sflag [#allocation4], %s280_s20 }
  0xbb   : > { %652 = dma.done.wait (%p417_p7), %s281_s2, 128  }
  0xbc   : > { %654 = vsyncadd (%p417_p7), %s281_s2, 4294967168  ;;  %s20_s19 = sadd.s32 1, %s685_s19   ;;  %s911_s27 = sld [smem:[#allocation14_spill]] }
  0xbd   : > { %p17_p9 = scmp.ge.s32.totalorder %s20_s19, 8   ;;  %s912_s10 = sld [smem:[#allocation15_spill]] }
  0xbe   : > { %s913_s12 = smov %s661_s13  ;;  %s914_s13 = smov %s665_s14 }
  0xbf   : > { %s915_s14 = smov %s818_s1  ;;  %s916_s15 = smov %s677_s17 }
  0xc0   : > { %s917_s16 = smov %s681_s18  ;;  %19 = sbr.rel (!%p17_p9) target bundleno = 11 (0xb), region = 85 }
  0xc2   : > { %s918_s17 = smov %s911_s27 }
  0xc3   : > { %s919_s18 = smov %s912_s10 }
  0xc5   :  { %287 = vsyncpa [#allocation3], 1 }
  0xc6   :  { %289 = vsyncpa [#allocation3 + $0x1], 1 }
  0xc7   :  { %290 = vsyncpa [#allocation6], 1 }
  0xc8   :  { %291 = vsyncpa [#allocation4], 1 }
  0xc9   :  { %293 = vsyncpa [#allocation4 + $0x1], 1 }

</bundles_post_ra>
